<compile_context>
chip_gen: v5e
topology: v5e:2x2
jax: 0.10.0
libtpu: 0.0.40
codegen_flags: <defaults>
</compile_context>

<pallas_src>
import functools

import jax
import jax.numpy as jnp
from jax.experimental import pallas as pl
from jax.experimental.pallas import tpu as pltpu

_MIB = 1024 * 1024


def _round_up(v, m):
    return ((v + m - 1) // m) * m


def _cdiv(a, b):
    return -(-a // b)


def _sublane_align(itemsize):
    # 8 sublanes for 32-bit, 16 for 16-bit, 32 for 8-bit dtypes.
    return 8 * max(1, 4 // itemsize)


def _physical_vmem_bytes():
    try:
        info = pltpu.get_tpu_info()
        cap = int(getattr(info, "vmem_capacity_bytes", 0) or 0)
        if cap > 0:
            return cap
    except Exception:
        pass
    return 128 * _MIB


def _maybe_split_for_megacore(num_rows, block, align, enable):
    """On v7x-like parts (2 TensorCores/chip), prefer an even grid-step count
    >= 4 along the parallel row axis: both cores get balanced work and each core
    keeps >= 2 steps so its DMA pipeline overlaps.  No-op on v5e/v6e."""
    if not enable:
        return block
    steps = _cdiv(num_rows, block)
    if steps >= 4 and steps % 2 == 0:
        return block
    target = max(4, steps + (steps % 2))
    if num_rows < target * align:
        return block
    return max(align, _round_up(_cdiv(num_rows, target), align))


# --------------------------------------------------------------------------- #
# Kernels
# --------------------------------------------------------------------------- #
def _gap_rows_kernel(x_ref, o_ref, acc_ref, *, hw, block_hw, inv_hw, need_mask):
    # x_ref: (block_rows, block_hw); o_ref: (block_rows, 1); acc_ref: f32 scratch.
    k = pl.program_id(1)

    @pl.when(k == 0)
    def _():
        acc_ref[...] = jnp.zeros_like(acc_ref)

    x = x_ref[...].astype(jnp.float32)
    if need_mask:
        # Last hw-block may extend past hw: OOB columns are undefined, mask them.
        col = jax.lax.broadcasted_iota(jnp.int32, x.shape, 1) + k * block_hw
        x = jnp.where(col < hw, x, 0.0)
    acc_ref[...] += jnp.sum(x, axis=-1, keepdims=True)

    @pl.when(k == pl.num_programs(1) - 1)
    def _():
        o_ref[...] = (acc_ref[...] * inv_hw).astype(o_ref.dtype)


def _gap_packed_kernel(x_ref, w_ref, o_ref, *, inv_hw):
    # x_ref: (block_prows, 128*hw); w_ref: (128*hw, 128); o_ref: (block_prows, 128)
    acc = jnp.dot(x_ref[...], w_ref[...], preferred_element_type=jnp.float32)
    o_ref[...] = (acc * inv_hw).astype(o_ref.dtype)


# --------------------------------------------------------------------------- #
# Path builders
# --------------------------------------------------------------------------- #
def _gap_rows_path(x2, nc, hw, dtype, itemsize, align, inv_hw,
                   total_budget, cap, is_v7x):
    padded_hw = _round_up(hw, 128)
    row_bytes = padded_hw * itemsize

    buf_count = 2
    per_buffer = max(1 * _MIB, min(8 * _MIB, (total_budget - 2 * _MIB) // buf_count))

    if align * row_bytes <= per_buffer:
        # Whole rows fit comfortably: tile over rows only.
        block_hw = hw
        block_rows = max(align, (per_buffer // row_bytes) // align * align)
    else:
        # Very large spatial extent: also tile hw (reduction axis, innermost grid
        # axis) and accumulate in f32 scratch.
        block_rows = align
        block_hw = min(padded_hw,
                       max(128, (per_buffer // (align * itemsize)) // 128 * 128))

    block_rows = min(block_rows, nc)
    block_rows = _maybe_split_for_megacore(nc, block_rows, align, is_v7x)
    if block_rows >= nc:
        block_rows = nc            # full dim: always a legal block shape

    row_steps = _cdiv(nc, block_rows)
    hw_steps = _cdiv(hw, block_hw)
    need_mask = (hw % block_hw) != 0

    # VMEM accounting uses sublane/lane-padded footprints.
    in_block_bytes = _round_up(block_rows, align) * _round_up(block_hw, 128) * itemsize
    out_block_bytes = _round_up(block_rows, align) * 128 * itemsize
    acc_bytes = _round_up(block_rows, align) * 128 * 4

    use_triple = (row_steps * hw_steps >= 3
                  and 3 * in_block_bytes + 2 * out_block_bytes + acc_bytes + 2 * _MIB
                  <= total_budget)
    if use_triple:
        buf_count = 3
        in_spec = pl.BlockSpec((block_rows, block_hw), lambda i, k: (i, k),
                               pipeline_mode=pl.Buffered(3))
    else:
        in_spec = pl.BlockSpec((block_rows, block_hw), lambda i, k: (i, k))

    vmem_limit = int(min(cap, max(32 * _MIB,
                                  buf_count * in_block_bytes + 2 * out_block_bytes
                                  + acc_bytes + 16 * _MIB)))

    kernel = functools.partial(_gap_rows_kernel, hw=hw, block_hw=block_hw,
                               inv_hw=inv_hw, need_mask=need_mask)

    return pl.pallas_call(
        kernel,
        out_shape=jax.ShapeDtypeStruct((nc, 1), dtype),
        grid_spec=pltpu.PrefetchScalarGridSpec(
            num_scalar_prefetch=0,
            grid=(row_steps, hw_steps),
            in_specs=[in_spec],
            out_specs=pl.BlockSpec((block_rows, 1), lambda i, k: (i, 0)),
            scratch_shapes=[pltpu.VMEM((block_rows, 1), jnp.float32)],
        ),
        compiler_params=pltpu.CompilerParams(
            dimension_semantics=("parallel", "arbitrary"),
            vmem_limit_bytes=vmem_limit,
        ),
        cost_estimate=pl.CostEstimate(
            flops=nc * hw,
            transcendentals=0,
            bytes_accessed=nc * hw * itemsize + nc * itemsize,
        ),
    )(x2)


def _gap_packed_path(x2, nc, hw, dtype, itemsize, align, inv_hw,
                     total_budget, cap, is_v7x, weight_bytes):
    nc_pad = _round_up(nc, 128)
    if nc_pad != nc:
        x2 = jnp.pad(x2, ((0, nc_pad - nc), (0, 0)))
    prows = nc_pad // 128
    packed_w = 128 * hw
    x_packed = x2.reshape(prows, packed_w)     # free reshape (row-major contiguous)

    # Ones block-diagonal reducer: row k*hw+j has a single 1.0 in column k, so
    # (x_packed @ wmat)[r, k] = sum_j x[r*128 + k, j].  Ones are exact in any
    # float dtype; the 1/hw scale is applied in f32 inside the kernel.
    wmat = jnp.repeat(jnp.eye(128, dtype=dtype), hw, axis=0)

    buf_count = 2
    packed_row_bytes = packed_w * itemsize
    avail = max(2 * _MIB, total_budget - 2 * weight_bytes - 2 * _MIB)
    per_buffer = min(8 * _MIB, avail // buf_count)
    block_prows = max(align, (per_buffer // packed_row_bytes) // align * align)

    block_prows = min(block_prows, prows)
    block_prows = _maybe_split_for_megacore(prows, block_prows, align, is_v7x)
    if block_prows >= prows:
        block_prows = prows

    steps = _cdiv(prows, block_prows)
    in_block_bytes = _round_up(block_prows, align) * packed_row_bytes
    out_block_bytes = _round_up(block_prows, align) * 128 * itemsize

    use_triple = (steps >= 3
                  and 3 * in_block_bytes + 2 * weight_bytes + 2 * out_block_bytes
                  + 2 * _MIB <= total_budget)
    if use_triple:
        buf_count = 3
        x_spec = pl.BlockSpec((block_prows, packed_w), lambda i: (i, 0),
                              pipeline_mode=pl.Buffered(3))
    else:
        x_spec = pl.BlockSpec((block_prows, packed_w), lambda i: (i, 0))

    vmem_limit = int(min(cap, max(32 * _MIB,
                                  buf_count * in_block_bytes + 2 * weight_bytes
                                  + 2 * out_block_bytes + 16 * _MIB)))

    kernel = functools.partial(_gap_packed_kernel, inv_hw=inv_hw)

    out = pl.pallas_call(
        kernel,
        out_shape=jax.ShapeDtypeStruct((prows, 128), dtype),
        grid_spec=pltpu.PrefetchScalarGridSpec(
            num_scalar_prefetch=0,
            grid=(steps,),
            in_specs=[x_spec,
                      pl.BlockSpec((packed_w, 128), lambda i: (0, 0))],
            out_specs=pl.BlockSpec((block_prows, 128), lambda i: (i, 0)),
        ),
        compiler_params=pltpu.CompilerParams(
            dimension_semantics=("parallel",),
            vmem_limit_bytes=vmem_limit,
        ),
        cost_estimate=pl.CostEstimate(
            flops=2 * nc_pad * hw * 128,
            transcendentals=0,
            bytes_accessed=nc_pad * hw * itemsize + weight_bytes + nc_pad * itemsize,
        ),
    )(x_packed, wmat)

    return out.reshape(nc_pad)[:nc]


# --------------------------------------------------------------------------- #
# Public wrapper
# --------------------------------------------------------------------------- #
def global_avg_pool2d(x):
    """Equivalent of F.avg_pool2d(x, kernel_size=x.size()[2:]) for NCHW input."""
    n, c, h, w = x.shape
    hw = h * w
    nc = n * c
    dtype = x.dtype
    itemsize = jnp.dtype(dtype).itemsize
    align = _sublane_align(itemsize)
    inv_hw = 1.0 / float(hw)

    cap = _physical_vmem_bytes()
    is_v7x = cap < 96 * _MIB                 # v7x: 64 MiB/TC; v5e/v6e: 128 MiB
    # Budget for all pipelined buffers; leaves headroom for compiler scratch.
    # ~40 MiB on v5e/v6e, ~24 MiB on v7x.
    total_budget = min(40 * _MIB, max(16 * _MIB, cap // 2 - 8 * _MIB))

    x2 = x.reshape(nc, hw)
    weight_bytes = 128 * hw * 128 * itemsize
    use_packed = (hw % 128 != 0) and (weight_bytes <= 4 * _MIB)

    if use_packed:
        out = _gap_packed_path(x2, nc, hw, dtype, itemsize, align, inv_hw,
                               total_budget, cap, is_v7x, weight_bytes)
    else:
        out = _gap_rows_path(x2, nc, hw, dtype, itemsize, align, inv_hw,
                             total_budget, cap, is_v7x)
    return out.reshape(n, c, 1, 1)


def _reference(x):
    return jnp.mean(x, axis=(2, 3), keepdims=True)


def _check(x):
    y = global_avg_pool2d(x)
    jax.block_until_ready(y)
    y_ref = _reference(x)
    assert y.shape == y_ref.shape, (y.shape, y_ref.shape)
    assert y.dtype == x.dtype
    assert jnp.allclose(y, y_ref, atol=1e-5, rtol=1e-5), "mismatch vs reference"


if __name__ == "__main__":
    # Module-implied small shape (row-streaming path): batch=2, channels=4, 16x16.
    _check(jax.random.normal(jax.random.PRNGKey(0), (2, 4, 16, 16), jnp.float32))

    # ResNet-50 style GAP (7x7 spatial): lane-dense packed + MXU path.
    _check(jax.random.normal(jax.random.PRNGKey(1), (2, 256, 7, 7), jnp.float32))

    # Ragged N*C on the packed path (pads rows to a multiple of 128).
    _check(jax.random.normal(jax.random.PRNGKey(2), (3, 5, 7, 7), jnp.float32))

    # Very large spatial extent: exercises the hw-tiled ("arbitrary" axis)
    # accumulator with in-kernel tail masking.
    _check(jax.random.normal(jax.random.PRNGKey(3), (1, 3, 512, 680), jnp.float32))

    print("KERNEL_OK")
</pallas_src>

<mosaic_0001>
module attributes {stable_mosaic.version = 11 : i64} {
  func.func @_gap_rows_kernel(%arg0: i32, %arg1: i32, %arg2: memref<8x256xf32, #tpu.memory_space<vmem>>, %arg3: memref<8x1xf32, #tpu.memory_space<vmem>>, %arg4: memref<8x1xf32, #tpu.memory_space<vmem>>) attributes {dimension_semantics = [#tpu.dimension_semantics<parallel>, #tpu.dimension_semantics<arbitrary>], iteration_bounds = array<i64: 1, 1>, scalar_prefetch = 0 : i64, scratch_operands = 1 : i64, tpu.core_type = #tpu.core_type<tc>, window_params = [{transform_indices = @transform_0, window_bounds = array<i64: 8, 256>}, {transform_indices = @transform_1, window_bounds = array<i64: 8, 1>}]} {
    %c0_i32 = arith.constant 0 : i32
    %0 = arith.cmpi eq, %arg1, %c0_i32 : i32
    %1 = arith.extui %0 : i1 to i32
    %c0_i32_0 = arith.constant 0 : i32
    %2 = arith.cmpi ne, %1, %c0_i32_0 : i32
    scf.if %2 {
      %cst_8 = arith.constant 0.000000e+00 : f32
      %12 = vector.broadcast %cst_8 : f32 to vector<8x1xf32>
      %c0_9 = arith.constant 0 : index
      %c0_10 = arith.constant 0 : index
      %13 = vector.load %arg4[%c0_9, %c0_10] : memref<8x1xf32, #tpu.memory_space<vmem>>, vector<8x1xf32>
      tpu.vector_store %arg4[%c0_9, %c0_10], %12 {strides = array<i32>} : memref<8x1xf32, #tpu.memory_space<vmem>>, vector<8x1xf32>,
    } else {
    }
    %c0 = arith.constant 0 : index
    %c0_1 = arith.constant 0 : index
    %3 = vector.load %arg2[%c0, %c0_1] : memref<8x256xf32, #tpu.memory_space<vmem>>, vector<8x256xf32>
    %c0_2 = arith.constant 0 : index
    %c0_3 = arith.constant 0 : index
    %4 = vector.load %arg4[%c0_2, %c0_3] : memref<8x1xf32, #tpu.memory_space<vmem>>, vector<8x1xf32>
    %cst = arith.constant dense<0.000000e+00> : vector<8xf32>
    %5 = vector.multi_reduction <add>, %3, %cst [1] : vector<8x256xf32> to vector<8xf32>
    %6 = vector.shape_cast %5 : vector<8xf32> to vector<8x1xf32>
    %7 = arith.addf %4, %6 : vector<8x1xf32>
    %c0_4 = arith.constant 0 : index
    %c0_5 = arith.constant 0 : index
    %8 = vector.load %arg4[%c0_4, %c0_5] : memref<8x1xf32, #tpu.memory_space<vmem>>, vector<8x1xf32>
    tpu.vector_store %arg4[%c0_4, %c0_5], %7 {strides = array<i32>} : memref<8x1xf32, #tpu.memory_space<vmem>>, vector<8x1xf32>,
    %c0_i32_6 = arith.constant 0 : i32
    %9 = arith.cmpi eq, %arg1, %c0_i32_6 : i32
    %10 = arith.extui %9 : i1 to i32
    %c0_i32_7 = arith.constant 0 : i32
    %11 = arith.cmpi ne, %10, %c0_i32_7 : i32
    scf.if %11 {
      %c0_8 = arith.constant 0 : index
      %c0_9 = arith.constant 0 : index
      %12 = vector.load %arg4[%c0_8, %c0_9] : memref<8x1xf32, #tpu.memory_space<vmem>>, vector<8x1xf32>
      %cst_10 = arith.constant 3.906250e-03 : f32
      %13 = vector.broadcast %cst_10 : f32 to vector<8x1xf32>
      %14 = arith.mulf %12, %13 : vector<8x1xf32>
      %c0_11 = arith.constant 0 : index
      %c0_12 = arith.constant 0 : index
      %15 = vector.load %arg3[%c0_11, %c0_12] : memref<8x1xf32, #tpu.memory_space<vmem>>, vector<8x1xf32>
      tpu.vector_store %arg3[%c0_11, %c0_12], %14 {strides = array<i32>} : memref<8x1xf32, #tpu.memory_space<vmem>>, vector<8x1xf32>,
    } else {
    }
    return
  }
  func.func @transform_0(%arg0: i32, %arg1: i32) -> (i32, i32) {
    %c0_i32 = arith.constant 0 : i32
    return %arg0, %arg1 : i32, i32
  }
  func.func @transform_1(%arg0: i32, %arg1: i32) -> (i32, i32) {
    %c0_i32 = arith.constant 0 : i32
    %c0_i32_0 = arith.constant 0 : i32
    return %arg0, %c0_i32 : i32, i32
  }
}

</mosaic_0001>

<bundles_post_ra>
// kernel: tpu_custom_call.1
= control target key start
LH: loop header
LB: loop body
LE: loop exit
PB: predicated region body
PF: predicated region fallthrough
CT: control target
= control target key end

     0   :  { %6 = vsyncpa [#allocation4], 0  ;;  %s76_s9 = smov [#allocation3]   ;;  %s94_s0 = inlined_call_operand.hbm [shape: f32[8,256], index: 0, kind: input, shape index: {}]   ;;  %s95_s1 = inlined_call_operand.vmem [shape: f32[8,1], index: 1, kind: output, shape index: {}]  }
   0x1   :  { %s12_s8 = sshll.u32 %s94_s0, 4  ;;  %s14_s10 = sshll.u32 %s76_s9, 4  ;;  %s13_s8 = int_to_ptr.hbm [resolvable:$true] %s12_s8  ;;  %s15_s10 = int_to_ptr.vmem [resolvable:$true] %s14_s10 }
   0x2   :  { %17 = dma.hbm_to_vmem [thread:$0]  %s13_s8, 256, %s15_s10, [#allocation4]  }
   0x3   :  { %74 = dma.done.wait [#allocation4], 256  }
   0x4   :  { %75 = vsyncadd [#allocation4], 4294967040  ;;  %vm26_vm0 = vcmask 7168   ;;  %v77_v0 = vmov 0.0   ;;  %v28_v1 = vld [vmem:[#allocation3] sm:$0xff]  ;;  %v29_v2 = vld [vmem:[#allocation3 + $0x8] sm:$0xff] }
   0x5   :  { %27 = vst.msk [vmem:[#allocation2] sm:$0xff] %vm26_vm0, %v77_v0  ;;  %v31_v3 = vadd.f32 %v29_v2, %v28_v1 }
   0x7   :  { %32 = vadd.xlane.f32.xlu0 %v31_v3 }
   0xc   :  { %v30_v4 = vld [vmem:[#allocation2] sm:$0xff] }
  0x7a   :  { %v33_v5 = vpop.xlane.xlu0 %32 }
  0x7b   :  { %v34_v6 = vadd.f32 %v33_v5, %v30_v4 }
  0x7d   :  { %36 = vst.msk [vmem:[#allocation2] sm:$0xff] %vm26_vm0, %v34_v6 }
  0x84   :  { %v40_v7 = vld [vmem:[#allocation2] sm:$0xff] }
  0x85   :  { %v41_v8 = vmul.f32 0.00390625, %v40_v7 }
  0x87   :  { %42 = vst.msk [vmem:[%s95_s1] sm:$0xff] %vm26_vm0, %v41_v8 }
  0x88   :  { %47 = vsyncpa [#allocation4], 1 }

</bundles_post_ra>
